<compile_context>
chip_gen: v5e
topology: v5e:2x2
jax: 0.10.0
libtpu: 0.0.40
codegen_flags: <defaults>
</compile_context>

<pallas_src>
import jax
import jax.numpy as jnp
from jax.experimental import pallas as pl
from jax.experimental.pallas import tpu as pltpu


def mlp_kernel(x_ref, w1_ref, b1_ref, w2_ref, b2_ref, o_ref):
    # out = relu(x @ W1 + b1) @ W2 + b2 for one batch tile, fully fused in VMEM.
    h = jnp.dot(x_ref[...], w1_ref[...], preferred_element_type=jnp.float32)
    h = jnp.maximum(h + b1_ref[...], 0.0)          # bias broadcast + ReLU on the VPU
    # Intentional: cast hidden activation to the weight dtype before the second
    # matmul (keeps MXU throughput if weights are later stored in bf16).
    y = jnp.dot(h.astype(w2_ref.dtype), w2_ref[...],
                preferred_element_type=jnp.float32)
    o_ref[...] = (y + b2_ref[...]).astype(o_ref.dtype)


def _round_up(x, m):
    return (x + m - 1) // m * m


def feedforward_nn(x, w1, b1, w2, b2, *, tile_b=256, vmem_limit_bytes=32 * 1024 * 1024):
    """x: (B, input_size); w1: (input_size, hidden); b1: (1, hidden);
       w2: (hidden, num_classes); b2: (1, num_classes)."""
    B, input_size = x.shape
    hidden = w1.shape[1]
    num_classes = w2.shape[1]
    dtype = x.dtype

    # Lane-pad the two feature dims that appear as last (lane) dims of the
    # MXU tiles / output store. Zero padding is exact: padded hidden columns
    # compute relu(0 + 0) = 0 and multiply zero rows of W2; padded class
    # columns are 0 + 0 and get sliced off.
    hidden_p = _round_up(hidden, 128)
    classes_p = _round_up(num_classes, 128)

    # Batch tile: multiple of 8 (sublane), capped at tile_b, no bigger than needed.
    tile_b = max(8, min(tile_b, _round_up(B, 8)))
    B_p = _round_up(B, tile_b)

    x_p = jnp.pad(x, ((0, B_p - B), (0, 0)))
    w1_p = jnp.pad(w1, ((0, 0), (0, hidden_p - hidden)))
    b1_p = jnp.pad(b1, ((0, 0), (0, hidden_p - hidden)))
    w2_p = jnp.pad(w2, ((0, hidden_p - hidden), (0, classes_p - num_classes)))
    b2_p = jnp.pad(b2, ((0, 0), (0, classes_p - num_classes)))

    grid = (B_p // tile_b,)

    itemsize = jnp.dtype(dtype).itemsize
    cost = pl.CostEstimate(
        flops=2 * B_p * (input_size * hidden_p + hidden_p * classes_p),
        transcendentals=0,
        bytes_accessed=(x_p.size + w1_p.size + b1_p.size + w2_p.size + b2_p.size
                        + B_p * classes_p) * itemsize,
    )

    out_p = pl.pallas_call(
        mlp_kernel,
        out_shape=jax.ShapeDtypeStruct((B_p, classes_p), dtype),
        grid_spec=pltpu.PrefetchScalarGridSpec(
            num_scalar_prefetch=0,
            grid=grid,
            in_specs=[
                # x: one batch tile per grid step (pipelined / double-buffered).
                pl.BlockSpec((tile_b, input_size), lambda i: (i, 0)),
                # Weights and biases: resident, replicated across the grid.
                pl.BlockSpec((input_size, hidden_p), lambda i: (0, 0)),
                pl.BlockSpec((1, hidden_p), lambda i: (0, 0)),
                pl.BlockSpec((hidden_p, classes_p), lambda i: (0, 0)),
                pl.BlockSpec((1, classes_p), lambda i: (0, 0)),
            ],
            out_specs=pl.BlockSpec((tile_b, classes_p), lambda i: (i, 0)),
        ),
        compiler_params=pltpu.CompilerParams(
            # Independent batch tiles -> shard across TensorCores on v7x.
            dimension_semantics=("parallel",),
            vmem_limit_bytes=vmem_limit_bytes,
        ),
        cost_estimate=cost,
    )(x_p, w1_p, b1_p, w2_p, b2_p)

    return out_p[:B, :num_classes]


def init_params(key, input_size, hidden_size, num_classes, dtype=jnp.float32):
    # Deterministic PyTorch-style init: U(-1/sqrt(fan_in), 1/sqrt(fan_in)).
    k1, k2, k3, k4 = jax.random.split(key, 4)
    bound1 = 1.0 / jnp.sqrt(input_size)
    bound2 = 1.0 / jnp.sqrt(hidden_size)
    w1 = jax.random.uniform(k1, (input_size, hidden_size), dtype, -bound1, bound1)
    b1 = jax.random.uniform(k2, (1, hidden_size), dtype, -bound1, bound1)
    w2 = jax.random.uniform(k3, (hidden_size, num_classes), dtype, -bound2, bound2)
    b2 = jax.random.uniform(k4, (1, num_classes), dtype, -bound2, bound2)
    return w1, b1, w2, b2


if __name__ == "__main__":
    input_size = 64
    hidden_size = 32
    num_classes = 16

    key = jax.random.PRNGKey(0)
    kx, kp, kx2 = jax.random.split(key, 3)
    w1, b1, w2, b2 = init_params(kp, input_size, hidden_size, num_classes)

    def ref_fn(x):
        return jnp.maximum(x @ w1 + b1, 0.0) @ w2 + b2

    # Small batch (single tile, exercises lane padding + slice-back).
    x_small = jax.random.normal(kx, (8, input_size), jnp.float32)
    out_small = jax.block_until_ready(feedforward_nn(x_small, w1, b1, w2, b2))
    assert out_small.shape == (8, num_classes)
    assert jnp.allclose(out_small, ref_fn(x_small), atol=1e-5, rtol=1e-5)

    # Larger ragged batch (exercises batch tiling, grid > 1, batch padding).
    x_big = jax.random.normal(kx2, (300, input_size), jnp.float32)
    out_big = jax.block_until_ready(feedforward_nn(x_big, w1, b1, w2, b2))
    assert out_big.shape == (300, num_classes)
    assert jnp.allclose(out_big, ref_fn(x_big), atol=1e-5, rtol=1e-5)

    print("KERNEL_OK")
</pallas_src>

<mosaic_0001>
module attributes {stable_mosaic.version = 11 : i64} {
  func.func @mlp_kernel(%arg0: i32, %arg1: memref<8x64xf32, #tpu.memory_space<vmem>>, %arg2: memref<64x128xf32, #tpu.memory_space<vmem>>, %arg3: memref<1x128xf32, #tpu.memory_space<vmem>>, %arg4: memref<128x128xf32, #tpu.memory_space<vmem>>, %arg5: memref<1x128xf32, #tpu.memory_space<vmem>>, %arg6: memref<8x128xf32, #tpu.memory_space<vmem>>) attributes {dimension_semantics = [#tpu.dimension_semantics<parallel>], iteration_bounds = array<i64: 1>, scalar_prefetch = 0 : i64, scratch_operands = 0 : i64, tpu.core_type = #tpu.core_type<tc>, window_params = [{transform_indices = @transform_0, window_bounds = array<i64: 8, 64>}, {pipeline_mode = #tpu.pipeline_mode<synchronous>, transform_indices = @transform_1, window_bounds = array<i64: 64, 128>}, {pipeline_mode = #tpu.pipeline_mode<synchronous>, transform_indices = @transform_2, window_bounds = array<i64: 1, 128>}, {pipeline_mode = #tpu.pipeline_mode<synchronous>, transform_indices = @transform_3, window_bounds = array<i64: 128, 128>}, {pipeline_mode = #tpu.pipeline_mode<synchronous>, transform_indices = @transform_4, window_bounds = array<i64: 1, 128>}, {transform_indices = @transform_5, window_bounds = array<i64: 8, 128>}]} {
    %c0 = arith.constant 0 : index
    %c0_0 = arith.constant 0 : index
    %0 = vector.load %arg1[%c0, %c0_0] : memref<8x64xf32, #tpu.memory_space<vmem>>, vector<8x64xf32>
    %c0_1 = arith.constant 0 : index
    %c0_2 = arith.constant 0 : index
    %1 = vector.load %arg2[%c0_1, %c0_2] : memref<64x128xf32, #tpu.memory_space<vmem>>, vector<64x128xf32>
    %cst = arith.constant dense<0.000000e+00> : vector<8x128xf32>
    %2 = tpu.matmul %0, %1, %cst {dimension_numbers = #tpu.dot_dimension_numbers<[1], [0], [0], [1], [0, 0, 1, 1], [], []>} : vector<8x64xf32>, vector<64x128xf32>, vector<8x128xf32> -> vector<8x128xf32>
    %c0_3 = arith.constant 0 : index
    %c0_4 = arith.constant 0 : index
    %3 = vector.load %arg3[%c0_3, %c0_4] : memref<1x128xf32, #tpu.memory_space<vmem>>, vector<1x128xf32>
    %4 = vector.broadcast %3 : vector<1x128xf32> to vector<8x128xf32>
    %5 = arith.addf %2, %4 : vector<8x128xf32>
    %cst_5 = arith.constant 0.000000e+00 : f32
    %6 = vector.broadcast %cst_5 : f32 to vector<8x128xf32>
    %7 = arith.maximumf %5, %6 : vector<8x128xf32>
    %c0_6 = arith.constant 0 : index
    %c0_7 = arith.constant 0 : index
    %8 = vector.load %arg4[%c0_6, %c0_7] : memref<128x128xf32, #tpu.memory_space<vmem>>, vector<128x128xf32>
    %cst_8 = arith.constant dense<0.000000e+00> : vector<8x128xf32>
    %9 = tpu.matmul %7, %8, %cst_8 {dimension_numbers = #tpu.dot_dimension_numbers<[1], [0], [0], [1], [0, 0, 1, 1], [], []>} : vector<8x128xf32>, vector<128x128xf32>, vector<8x128xf32> -> vector<8x128xf32>
    %c0_9 = arith.constant 0 : index
    %c0_10 = arith.constant 0 : index
    %10 = vector.load %arg5[%c0_9, %c0_10] : memref<1x128xf32, #tpu.memory_space<vmem>>, vector<1x128xf32>
    %11 = vector.broadcast %10 : vector<1x128xf32> to vector<8x128xf32>
    %12 = arith.addf %9, %11 : vector<8x128xf32>
    %c0_11 = arith.constant 0 : index
    %c0_12 = arith.constant 0 : index
    %13 = vector.load %arg6[%c0_11, %c0_12] : memref<8x128xf32, #tpu.memory_space<vmem>>, vector<8x128xf32>
    tpu.vector_store %arg6[%c0_11, %c0_12], %12 {strides = array<i32>} : memref<8x128xf32, #tpu.memory_space<vmem>>, vector<8x128xf32>,
    return
  }
  func.func @transform_0(%arg0: i32) -> (i32, i32) {
    %c0_i32 = arith.constant 0 : i32
    %c0_i32_0 = arith.constant 0 : i32
    return %arg0, %c0_i32 : i32, i32
  }
  func.func @transform_1(%arg0: i32) -> (i32, i32) {
    %c0_i32 = arith.constant 0 : i32
    %c0_i32_0 = arith.constant 0 : i32
    %c0_i32_1 = arith.constant 0 : i32
    return %c0_i32, %c0_i32_0 : i32, i32
  }
  func.func @transform_2(%arg0: i32) -> (i32, i32) {
    %c0_i32 = arith.constant 0 : i32
    %c0_i32_0 = arith.constant 0 : i32
    %c0_i32_1 = arith.constant 0 : i32
    return %c0_i32, %c0_i32_0 : i32, i32
  }
  func.func @transform_3(%arg0: i32) -> (i32, i32) {
    %c0_i32 = arith.constant 0 : i32
    %c0_i32_0 = arith.constant 0 : i32
    %c0_i32_1 = arith.constant 0 : i32
    return %c0_i32, %c0_i32_0 : i32, i32
  }
  func.func @transform_4(%arg0: i32) -> (i32, i32) {
    %c0_i32 = arith.constant 0 : i32
    %c0_i32_0 = arith.constant 0 : i32
    %c0_i32_1 = arith.constant 0 : i32
    return %c0_i32, %c0_i32_0 : i32, i32
  }
  func.func @transform_5(%arg0: i32) -> (i32, i32) {
    %c0_i32 = arith.constant 0 : i32
    %c0_i32_0 = arith.constant 0 : i32
    return %arg0, %c0_i32 : i32, i32
  }
}

</mosaic_0001>

<bundles_post_ra>
// kernel: tpu_custom_call.1
= control target key start
LH: loop header
LB: loop body
LE: loop exit
PB: predicated region body
PF: predicated region fallthrough
CT: control target
= control target key end

     0   :  { %10 = vsyncpa [#allocation3], 0  ;;  %s328_s0 = inlined_call_operand.hbm [shape: f32[8,64], index: 0, kind: input, shape index: {}]   ;;  %s329_s1 = inlined_call_operand.hbm [shape: f32[64,128], index: 1, kind: input, shape index: {}]   ;;  %s330_s2 = inlined_call_operand.vmem [shape: f32[1,128], index: 2, kind: input, shape index: {}]   ;;  %s331_s3 = inlined_call_operand.hbm [shape: f32[128,128], index: 3, kind: input, shape index: {}]   ;;  %s332_s4 = inlined_call_operand.vmem [shape: f32[1,128], index: 4, kind: input, shape index: {}]   ;;  %s333_s5 = inlined_call_operand.hbm [shape: f32[8,128], index: 5, kind: output, shape index: {}]  }
   0x1   :  { %11 = vsyncpa [#allocation6], 0  ;;  %s28_s20 = sshll.u32 %s329_s1, 4  ;;  %s29_s20 = int_to_ptr.hbm [resolvable:$true] %s28_s20 }
   0x2   :  { %12 = vsyncpa [#allocation4], 0  ;;  %s274_s21 = smov [#allocation5]   ;;  %s18_s25 = sshll.u32 %s328_s0, 4  ;;  %s19_s25 = int_to_ptr.hbm [resolvable:$true] %s18_s25 }
   0x3   :  { %s30_s22 = sshll.u32 %s274_s21, 4  ;;  %s275_s26 = smov 128   ;;  %s31_s22 = int_to_ptr.vmem [resolvable:$true] %s30_s22 }
   0x4   :  { %s276_s27 = smov 8   ;;  %s277_s28 = smov [#allocation2]  }
   0x5   :  { %36 = dma.hbm_to_vmem [thread:$0]  %s29_s20, 1024, %s31_s22, [#allocation6], %s275_s26, %s275_s26, %s276_s27  }
   0x6   :  { %s20_s29 = sshll.u32 %s277_s28, 4  ;;  %s43_s7 = sshll.u32 %s331_s3, 4  ;;  %s21_s29 = int_to_ptr.vmem [resolvable:$true] %s20_s29  ;;  %s44_s7 = int_to_ptr.hbm [resolvable:$true] %s43_s7 }
   0x7   :  { %23 = dma.hbm_to_vmem [thread:$0]  %s19_s25, 128, %s21_s29, [#allocation3]  }
   0x8   :  { %s278_s1 = smov [#allocation7]  }
   0x9   :  { %s45_s8 = sshll.u32 %s278_s1, 4  ;;  %s46_s8 = int_to_ptr.vmem [resolvable:$true] %s45_s8 }
   0xa   :  { %51 = dma.hbm_to_vmem [thread:$0]  %s44_s7, 2048, %s46_s8, [#allocation6], %s275_s26, %s275_s26, %s276_s27  }
   0xb   :  { %268 = dma.done.wait [#allocation3], 128  }
   0xc   :  { %269 = vsyncadd [#allocation3], 4294967168 }
   0xd   :  { %270 = dma.done.wait [#allocation6], 3072  }
   0xe   :  { %271 = vsyncadd [#allocation6], 4294964224  ;;  %v74_v0 = vld [vmem:[#allocation5 + $0x38] sm:$0xff]  ;;  %v73_v1 = vld [vmem:[#allocation5 + $0x30] sm:$0xff]  ;;  %vm79_vm0 = vcmask 523264   ;;  %s279_s11 = smov [#allocation8]  }
   0xf   :  { %91 = vmatpush.msra.mxu0 %v74_v0  ;;  %v72_v2 = vld [vmem:[#allocation5 + $0x28] sm:$0xff]  ;;  %v119_v3 = vld [vmem:[#allocation7 + $0x78] sm:$0xff]  ;;  %v118_v4 = vld [vmem:[#allocation7 + $0x70] sm:$0xff]  ;;  %s150_s12 = sshll.u32 %s279_s11, 4  ;;  %s152_s15 = sshll.u32 %s333_s5, 4  ;;  %s151_s12 = int_to_ptr.vmem [resolvable:$true] %s150_s12  ;;  %s153_s15 = int_to_ptr.hbm [resolvable:$true] %s152_s15 }
  0x10   :  { %v71_v5 = vld [vmem:[#allocation5 + $0x20] sm:$0xff]  ;;  %124 = vmatpush.msra.mxu1 %v119_v3  ;;  %v117_v6 = vld [vmem:[#allocation7 + $0x68] sm:$0xff]  ;;  %v70_v7 = vld [vmem:[#allocation5 + $0x18] sm:$0xff] }
  0x11   :  { %92 = vmatpush.msra.mxu0 %v73_v1  ;;  %v116_v8 = vld [vmem:[#allocation7 + $0x60] sm:$0xff]  ;;  %v69_v9 = vld [vmem:[#allocation5 + $0x10] sm:$0xff]  ;;  %v115_v10 = vld [vmem:[#allocation7 + $0x58] sm:$0xff] }
  0x12   :  { %125 = vmatpush.msra.mxu1 %v118_v4  ;;  %v68_v11 = vld [vmem:[#allocation5 + $0x8] sm:$0xff]  ;;  %v114_v12 = vld [vmem:[#allocation7 + $0x50] sm:$0xff]  ;;  %v67_v13 = vld [vmem:[#allocation5] sm:$0xff] }
  0x13   :  { %93 = vmatpush.msra.mxu0 %v72_v2  ;;  %v66_v14 = vld [vmem:[#allocation2] sm:$0xff]  ;;  %v113_v15 = vld [vmem:[#allocation7 + $0x48] sm:$0xff]  ;;  %v112_v16 = vld [vmem:[#allocation7 + $0x40] sm:$0xff] }
  0x14   :  { %126 = vmatpush.msra.mxu1 %v117_v6  ;;  %v111_v17 = vld [vmem:[#allocation7 + $0x38] sm:$0xff]  ;;  %v110_v18 = vld [vmem:[#allocation7 + $0x30] sm:$0xff]  ;;  %v109_v19 = vld [vmem:[#allocation7 + $0x28] sm:$0xff] }
  0x15   :  { %94 = vmatpush.msra.mxu0 %v71_v5  ;;  %v108_v20 = vld [vmem:[#allocation7 + $0x20] sm:$0xff]  ;;  %v107_v21 = vld [vmem:[#allocation7 + $0x18] sm:$0xff]  ;;  %v106_v22 = vld [vmem:[#allocation7 + $0x10] sm:$0xff] }
  0x16   :  { %127 = vmatpush.msra.mxu1 %v116_v8  ;;  %v105_v23 = vld [vmem:[#allocation7 + $0x8] sm:$0xff]  ;;  %v104_v24 = vld [vmem:[#allocation7] sm:$0xff]  ;;  %v170_v25 = vld [vmem:[%s330_s2] ss:$0 sm:$0xff] }
  0x17   :  { %95 = vmatpush.msra.mxu0 %v70_v7  ;;  %v171_v29 = vld [vmem:[%s332_s4] ss:$0 sm:$0xff] }
  0x18   :  { %128 = vmatpush.msra.mxu1 %v115_v10 }
  0x19   :  { %96 = vmatpush.msra.mxu0 %v69_v9 }
  0x1a   :  { %129 = vmatpush.msra.mxu1 %v114_v12 }
  0x1b   :  { %97 = vmatpush.msra.mxu0 %v68_v11 }
  0x1c   :  { %130 = vmatpush.msra.mxu1 %v113_v15 }
  0x1d   :  { %98 = vmatpush.msra.mxu0 %v67_v13 }
  0x1e   :  { %163 = vmatmul.msk.f32.vlgmr.msra.gmra.mxu0 %vm79_vm0, %v66_v14  ;;  %131 = vmatpush.msra.mxu1 %v112_v16 }
  0x20   :  { %132 = vmatpush.msra.mxu1 %v111_v17 }
  0x22   :  { %133 = vmatpush.msra.mxu1 %v110_v18 }
  0x24   :  { %134 = vmatpush.msra.mxu1 %v109_v19 }
  0x26   :  { %135 = vmatpush.msra.mxu1 %v108_v20 }
  0x28   :  { %136 = vmatpush.msra.mxu1 %v107_v21 }
  0x2a   :  { %137 = vmatpush.msra.mxu1 %v106_v22 }
  0x2c   :  { %138 = vmatpush.msra.mxu1 %v105_v23 }
  0x2e   :  { %139 = vmatpush.msra.mxu1 %v104_v24 }
  0x9b   :  { %v100_v26 = vpop.f32.mrf.mxu0 }
  0x9c   :  { %v101_v27 = vadd.f32 %v170_v25, %v100_v26 }
  0x9e   :  { %v103_v28 = vmax.f32 %v101_v27, 0.0 }
  0xa0   :  { %140 = vmatmul.f32.vlgmr.msra.gmra.mxu1 %v103_v28 }
 0x11d   :  { %v141_v30 = vpop.f32.mrf.mxu1 }
 0x11e   :  { %v142_v31 = vadd.f32 %v171_v29, %v141_v30 }
 0x120   :  { %144 = vst [vmem:[#allocation8] sm:$0xff] %v142_v31 }
 0x121   :  { %155 = dma.vmem_to_hbm [thread:$0]  %s151_s12, 128, %s153_s15, [#allocation4]  }
 0x122   :  { %272 = dma.done.wait [#allocation4], 128  }
 0x123   :  { %273 = vsyncadd [#allocation4], 4294967168 }
 0x124   :  { %160 = vsyncpa [#allocation3], 1 }
 0x125   :  { %161 = vsyncpa [#allocation6], 1 }
 0x126   :  { %162 = vsyncpa [#allocation4], 1 }

</bundles_post_ra>
